<compile_context>
chip_gen: v6e
topology: v6e:2x2x1
jax: 0.10.0
libtpu: 0.0.40
codegen_flags: <defaults>
</compile_context>

<pallas_src>
import jax
import jax.numpy as jnp
from jax.experimental import pallas as pl
from jax.experimental.pallas import tpu as pltpu


def _round_up(v, m):
    return ((v + m - 1) // m) * m


def mlp_kernel(x_ref, w1_ref, b1_ref, w2_ref, b2_ref, w3_ref, b3_ref, o_ref):
    # fc1 + ReLU
    h1 = jnp.dot(x_ref[...], w1_ref[...], preferred_element_type=jnp.float32)
    h1 = jnp.maximum(h1 + b1_ref[...], 0.0)
    # fc2 + ReLU
    h2 = jnp.dot(h1, w2_ref[...], preferred_element_type=jnp.float32)
    h2 = jnp.maximum(h2 + b2_ref[...], 0.0)
    # fc3 (output block is exactly num_classes wide -> only the bytes we need)
    out = jnp.dot(h2, w3_ref[...], preferred_element_type=jnp.float32)
    o_ref[...] = (out + b3_ref[...]).astype(o_ref.dtype)


def mlp_forward(x, params, *, block_b=1024):
    """Forward pass matching the PyTorch Model (weights stored as (in, out))."""
    w1, b1, w2, b2, w3, b3 = params
    B, f_in = x.shape
    h1_dim = w1.shape[1]          # 128
    h2_dim = w2.shape[1]          # 64
    num_classes = w3.shape[1]

    # Batch tile: multiple of 8 sublanes, as large as block_b allows (mem-bound
    # kernel -> bigger tiles amortize per-step overhead; VMEM use stays tiny).
    tb = min(block_b, _round_up(B, 8))
    # Keep at least 2 grid steps so ("parallel",) can shard the batch over
    # v7x's two TensorCores instead of serializing one giant tile on one TC.
    tb = min(tb, max(8, _round_up(pl.cdiv(B, 2), 8)))

    grid = (pl.cdiv(B, tb),)          # ragged last block handled by Pallas (no jnp.pad)
    resident = lambda i: (0, 0)       # same block every step -> stays in VMEM

    out = pl.pallas_call(
        mlp_kernel,
        out_shape=jax.ShapeDtypeStruct((B, num_classes), jnp.float32),
        grid=grid,
        in_specs=[
            pl.BlockSpec((tb, f_in), lambda i: (i, 0)),     # x tile (pipelined)
            pl.BlockSpec((f_in, h1_dim), resident),          # w1
            pl.BlockSpec((1, h1_dim), resident),             # b1
            pl.BlockSpec((h1_dim, h2_dim), resident),        # w2
            pl.BlockSpec((1, h2_dim), resident),             # b2
            pl.BlockSpec((h2_dim, num_classes), resident),   # w3
            pl.BlockSpec((1, num_classes), resident),        # b3
        ],
        out_specs=pl.BlockSpec((tb, num_classes), lambda i: (i, 0)),
        compiler_params=pltpu.CompilerParams(
            dimension_semantics=("parallel",),               # split batch over 2 TCs on v7x
        ),
    )(x, w1, b1, w2, b2, w3, b3)

    return out


def init_params(key, input_size, num_classes):
    """Deterministic init mimicking nn.Linear default (uniform +-1/sqrt(fan_in))."""
    ks = jax.random.split(key, 6)

    def linear(kw, kb, fan_in, fan_out):
        bound = 1.0 / jnp.sqrt(fan_in)
        w = jax.random.uniform(kw, (fan_in, fan_out), jnp.float32, -bound, bound)
        b = jax.random.uniform(kb, (1, fan_out), jnp.float32, -bound, bound)
        return w, b

    w1, b1 = linear(ks[0], ks[1], input_size, 128)
    w2, b2 = linear(ks[2], ks[3], 128, 64)
    w3, b3 = linear(ks[4], ks[5], 64, num_classes)
    return (w1, b1, w2, b2, w3, b3)


def _reference(x, params):
    w1, b1, w2, b2, w3, b3 = params
    h = jnp.maximum(x @ w1 + b1, 0.0)
    h = jnp.maximum(h @ w2 + b2, 0.0)
    return h @ w3 + b3


if __name__ == "__main__":
    key = jax.random.PRNGKey(0)
    k_x, k_x2, k_p = jax.random.split(key, 3)

    input_size = 32
    num_classes = 10
    params = init_params(k_p, input_size, num_classes)

    # Small primary run.
    batch = 8
    x = jax.random.normal(k_x, (batch, input_size), dtype=jnp.float32)
    out = mlp_forward(x, params)
    jax.block_until_ready(out)
    assert out.shape == (batch, num_classes)
    assert jnp.allclose(out, _reference(x, params), atol=2e-2, rtol=2e-2)

    # Ragged / multi-step grid run (exercises the partial last block + 2 TC split).
    batch2 = 200
    x2 = jax.random.normal(k_x2, (batch2, input_size), dtype=jnp.float32)
    out2 = mlp_forward(x2, params)
    jax.block_until_ready(out2)
    assert out2.shape == (batch2, num_classes)
    assert jnp.allclose(out2, _reference(x2, params), atol=2e-2, rtol=2e-2)

    print("KERNEL_OK")
</pallas_src>

<mosaic_0001>
module attributes {stable_mosaic.version = 11 : i64} {
  func.func @mlp_kernel(%arg0: i32, %arg1: memref<8x32xf32, #tpu.memory_space<vmem>>, %arg2: memref<32x128xf32, #tpu.memory_space<vmem>>, %arg3: memref<1x128xf32, #tpu.memory_space<vmem>>, %arg4: memref<128x64xf32, #tpu.memory_space<vmem>>, %arg5: memref<1x64xf32, #tpu.memory_space<vmem>>, %arg6: memref<64x10xf32, #tpu.memory_space<vmem>>, %arg7: memref<1x10xf32, #tpu.memory_space<vmem>>, %arg8: memref<8x10xf32, #tpu.memory_space<vmem>>) attributes {dimension_semantics = [#tpu.dimension_semantics<parallel>], iteration_bounds = array<i64: 1>, scalar_prefetch = 0 : i64, scratch_operands = 0 : i64, tpu.core_type = #tpu.core_type<tc>, window_params = [{transform_indices = @transform_0, window_bounds = array<i64: 8, 32>}, {pipeline_mode = #tpu.pipeline_mode<synchronous>, transform_indices = @transform_1, window_bounds = array<i64: 32, 128>}, {pipeline_mode = #tpu.pipeline_mode<synchronous>, transform_indices = @transform_2, window_bounds = array<i64: 1, 128>}, {pipeline_mode = #tpu.pipeline_mode<synchronous>, transform_indices = @transform_3, window_bounds = array<i64: 128, 64>}, {pipeline_mode = #tpu.pipeline_mode<synchronous>, transform_indices = @transform_4, window_bounds = array<i64: 1, 64>}, {pipeline_mode = #tpu.pipeline_mode<synchronous>, transform_indices = @transform_5, window_bounds = array<i64: 64, 10>}, {pipeline_mode = #tpu.pipeline_mode<synchronous>, transform_indices = @transform_6, window_bounds = array<i64: 1, 10>}, {transform_indices = @transform_7, window_bounds = array<i64: 8, 10>}]} {
    %c0 = arith.constant 0 : index
    %c0_0 = arith.constant 0 : index
    %0 = vector.load %arg1[%c0, %c0_0] : memref<8x32xf32, #tpu.memory_space<vmem>>, vector<8x32xf32>
    %c0_1 = arith.constant 0 : index
    %c0_2 = arith.constant 0 : index
    %1 = vector.load %arg2[%c0_1, %c0_2] : memref<32x128xf32, #tpu.memory_space<vmem>>, vector<32x128xf32>
    %cst = arith.constant dense<0.000000e+00> : vector<8x128xf32>
    %2 = tpu.matmul %0, %1, %cst {dimension_numbers = #tpu.dot_dimension_numbers<[1], [0], [0], [1], [0, 0, 1, 1], [], []>} : vector<8x32xf32>, vector<32x128xf32>, vector<8x128xf32> -> vector<8x128xf32>
    %c0_3 = arith.constant 0 : index
    %c0_4 = arith.constant 0 : index
    %3 = vector.load %arg3[%c0_3, %c0_4] : memref<1x128xf32, #tpu.memory_space<vmem>>, vector<1x128xf32>
    %4 = vector.broadcast %3 : vector<1x128xf32> to vector<8x128xf32>
    %5 = arith.addf %2, %4 : vector<8x128xf32>
    %cst_5 = arith.constant 0.000000e+00 : f32
    %6 = vector.broadcast %cst_5 : f32 to vector<8x128xf32>
    %7 = arith.maximumf %5, %6 : vector<8x128xf32>
    %c0_6 = arith.constant 0 : index
    %c0_7 = arith.constant 0 : index
    %8 = vector.load %arg4[%c0_6, %c0_7] : memref<128x64xf32, #tpu.memory_space<vmem>>, vector<128x64xf32>
    %cst_8 = arith.constant dense<0.000000e+00> : vector<8x64xf32>
    %9 = tpu.matmul %7, %8, %cst_8 {dimension_numbers = #tpu.dot_dimension_numbers<[1], [0], [0], [1], [0, 0, 1, 1], [], []>} : vector<8x128xf32>, vector<128x64xf32>, vector<8x64xf32> -> vector<8x64xf32>
    %c0_9 = arith.constant 0 : index
    %c0_10 = arith.constant 0 : index
    %10 = vector.load %arg5[%c0_9, %c0_10] : memref<1x64xf32, #tpu.memory_space<vmem>>, vector<1x64xf32>
    %11 = vector.broadcast %10 : vector<1x64xf32> to vector<8x64xf32>
    %12 = arith.addf %9, %11 : vector<8x64xf32>
    %cst_11 = arith.constant 0.000000e+00 : f32
    %13 = vector.broadcast %cst_11 : f32 to vector<8x64xf32>
    %14 = arith.maximumf %12, %13 : vector<8x64xf32>
    %c0_12 = arith.constant 0 : index
    %c0_13 = arith.constant 0 : index
    %15 = vector.load %arg6[%c0_12, %c0_13] : memref<64x10xf32, #tpu.memory_space<vmem>>, vector<64x10xf32>
    %cst_14 = arith.constant dense<0.000000e+00> : vector<8x10xf32>
    %16 = tpu.matmul %14, %15, %cst_14 {dimension_numbers = #tpu.dot_dimension_numbers<[1], [0], [0], [1], [0, 0, 1, 1], [], []>} : vector<8x64xf32>, vector<64x10xf32>, vector<8x10xf32> -> vector<8x10xf32>
    %c0_15 = arith.constant 0 : index
    %c0_16 = arith.constant 0 : index
    %17 = vector.load %arg7[%c0_15, %c0_16] : memref<1x10xf32, #tpu.memory_space<vmem>>, vector<1x10xf32>
    %18 = vector.broadcast %17 : vector<1x10xf32> to vector<8x10xf32>
    %19 = arith.addf %16, %18 : vector<8x10xf32>
    %c0_17 = arith.constant 0 : index
    %c0_18 = arith.constant 0 : index
    %20 = vector.load %arg8[%c0_17, %c0_18] : memref<8x10xf32, #tpu.memory_space<vmem>>, vector<8x10xf32>
    tpu.vector_store %arg8[%c0_17, %c0_18], %19 {strides = array<i32>} : memref<8x10xf32, #tpu.memory_space<vmem>>, vector<8x10xf32>,
    return
  }
  func.func @transform_0(%arg0: i32) -> (i32, i32) {
    %c0_i32 = arith.constant 0 : i32
    %c0_i32_0 = arith.constant 0 : i32
    return %arg0, %c0_i32 : i32, i32
  }
  func.func @transform_1(%arg0: i32) -> (i32, i32) {
    %c0_i32 = arith.constant 0 : i32
    %c0_i32_0 = arith.constant 0 : i32
    %c0_i32_1 = arith.constant 0 : i32
    return %c0_i32, %c0_i32_0 : i32, i32
  }
  func.func @transform_2(%arg0: i32) -> (i32, i32) {
    %c0_i32 = arith.constant 0 : i32
    %c0_i32_0 = arith.constant 0 : i32
    %c0_i32_1 = arith.constant 0 : i32
    return %c0_i32, %c0_i32_0 : i32, i32
  }
  func.func @transform_3(%arg0: i32) -> (i32, i32) {
    %c0_i32 = arith.constant 0 : i32
    %c0_i32_0 = arith.constant 0 : i32
    %c0_i32_1 = arith.constant 0 : i32
    return %c0_i32, %c0_i32_0 : i32, i32
  }
  func.func @transform_4(%arg0: i32) -> (i32, i32) {
    %c0_i32 = arith.constant 0 : i32
    %c0_i32_0 = arith.constant 0 : i32
    %c0_i32_1 = arith.constant 0 : i32
    return %c0_i32, %c0_i32_0 : i32, i32
  }
  func.func @transform_5(%arg0: i32) -> (i32, i32) {
    %c0_i32 = arith.constant 0 : i32
    %c0_i32_0 = arith.constant 0 : i32
    %c0_i32_1 = arith.constant 0 : i32
    return %c0_i32, %c0_i32_0 : i32, i32
  }
  func.func @transform_6(%arg0: i32) -> (i32, i32) {
    %c0_i32 = arith.constant 0 : i32
    %c0_i32_0 = arith.constant 0 : i32
    %c0_i32_1 = arith.constant 0 : i32
    return %c0_i32, %c0_i32_0 : i32, i32
  }
  func.func @transform_7(%arg0: i32) -> (i32, i32) {
    %c0_i32 = arith.constant 0 : i32
    %c0_i32_0 = arith.constant 0 : i32
    return %arg0, %c0_i32 : i32, i32
  }
}

</mosaic_0001>

<bundles_post_ra>
// kernel: tpu_custom_call.1
= control target key start
LH: loop header
LB: loop body
LE: loop exit
PB: predicated region body
PF: predicated region fallthrough
CT: control target
= control target key end

     0   :  { %v439_v1 = vmov 0.0   ;;  %vm440_vm0 = vmmov 0   ;;  %vm39_vm1 = vcmask 261120   ;;  %s615_s0 = inlined_call_operand.vmem [shape: f32[8,32], index: 0, kind: input, shape index: {}]   ;;  %s616_s1 = inlined_call_operand.vmem [shape: f32[32,128], index: 1, kind: input, shape index: {}]   ;;  %s617_s2 = inlined_call_operand.vmem [shape: f32[1,128], index: 2, kind: input, shape index: {}]   ;;  %s618_s3 = inlined_call_operand.vmem [shape: f32[128,64], index: 3, kind: input, shape index: {}]   ;;  %s619_s4 = inlined_call_operand.vmem [shape: f32[1,64], index: 4, kind: input, shape index: {}]   ;;  %s620_s5 = inlined_call_operand.vmem [shape: f32[64,10], index: 5, kind: input, shape index: {}]   ;;  %s621_s6 = inlined_call_operand.vmem [shape: f32[1,10], index: 6, kind: input, shape index: {}]   ;;  %s622_s7 = inlined_call_operand.hbm [shape: f32[8,10], index: 7, kind: output, shape index: {}]  }
   0x1   :  { %v31_v0 = vld [vmem:[%s616_s1 + $0x18] sm:$0xff]  ;;  %349 = vmatprep.subr.mxu0 %v439_v1  ;;  %v30_v2 = vld [vmem:[%s616_s1 + $0x10] sm:$0xff]  ;;  %357 = vmatprep.mubr.msk.f32.mxu0 %vm440_vm0, %v439_v1  ;;  %v29_v5 = vld [vmem:[%s616_s1 + $0x8] sm:$0xff] }
   0x2   :  { %v129_v3 = vld [vmem:[%s618_s3 + $0x78] sm:$0xff]  ;;  %350 = vmatpush3.msra.mxu0 %v31_v0  ;;  %360 = vmatprep.subr.mxu1 %v439_v1  ;;  %v128_v4 = vld [vmem:[%s618_s3 + $0x70] sm:$0xff]  ;;  %v127_v6 = vld [vmem:[%s618_s3 + $0x68] sm:$0xff] }
   0x3   :  { %351 = vmatprep.subr.mxu0 %v439_v1  ;;  %361 = vmatpush3.msra.mxu1 %v129_v3  ;;  %v28_v7 = vld [vmem:[%s616_s1] sm:$0xff] }
   0x4   :  { %352 = vmatpush3.msra.mxu0 %v30_v2  ;;  %362 = vmatprep.subr.mxu1 %v439_v1  ;;  %v27_v8 = vld [vmem:[%s615_s0] sm:$0xff] }
   0x5   :  { %353 = vmatprep.subr.mxu0 %v439_v1  ;;  %363 = vmatpush3.msra.mxu1 %v128_v4  ;;  %v126_v9 = vld [vmem:[%s618_s3 + $0x60] sm:$0xff] }
   0x6   :  { %354 = vmatpush3.msra.mxu0 %v29_v5  ;;  %364 = vmatprep.subr.mxu1 %v439_v1 }
   0x7   :  { %12 = vsyncpa [#allocation3], 0  ;;  %355 = vmatprep.subr.mxu0 %v439_v1  ;;  %365 = vmatpush3.msra.mxu1 %v127_v6  ;;  %v125_v10 = vld [vmem:[%s618_s3 + $0x58] sm:$0xff]  ;;  %v124_v11 = vld [vmem:[%s618_s3 + $0x50] sm:$0xff]  ;;  %vm223_vm2 = vcmask 523264   ;;  %s441_s13 = smov [#allocation2]  }
   0x8   :  { %356 = vmatpush3.msra.mxu0 %v28_v7  ;;  %366 = vmatprep.subr.mxu1 %v439_v1  ;;  %v123_v12 = vld [vmem:[%s618_s3 + $0x48] sm:$0xff]  ;;  %v122_v13 = vld [vmem:[%s618_s3 + $0x40] sm:$0xff]  ;;  %v121_v14 = vld [vmem:[%s618_s3 + $0x38] sm:$0xff]  ;;  %s305_s14 = sshll.u32 %s441_s13, 4  ;;  %vm297_vm3 = vcmask 80896   ;;  %s306_s14 = int_to_ptr.vmem [resolvable:$true] %s305_s14 }
   0x9   :  { %358 = vmatmul.mubr.msk.f32.vlgmr.msra.gmra.mxu0 %vm39_vm1, %v27_v8  ;;  %367 = vmatpush3.msra.mxu1 %v126_v9  ;;  %v120_v15 = vld [vmem:[%s618_s3 + $0x30] sm:$0xff]  ;;  %v119_v16 = vld [vmem:[%s618_s3 + $0x28] sm:$0xff]  ;;  %v118_v17 = vld [vmem:[%s618_s3 + $0x20] sm:$0xff]  ;;  %p422_p1 = scmp.lt.s32.totalorder %s306_s14, %s306_s14 }
   0xa   :  { %368 = vmatprep.subr.mxu1 %v439_v1  ;;  %392 = vmatprep.mubr.msk.f32.mxu1 %vm440_vm0, %v439_v1  ;;  %v117_v18 = vld [vmem:[%s618_s3 + $0x18] sm:$0xff]  ;;  %v116_v19 = vld [vmem:[%s618_s3 + $0x10] sm:$0xff]  ;;  %v115_v20 = vld [vmem:[%s618_s3 + $0x8] sm:$0xff] }
   0xb   :  { %369 = vmatpush3.msra.mxu1 %v125_v10  ;;  %395 = vmatprep.subr.mxu0 %v439_v1  ;;  %v114_v21 = vld [vmem:[%s618_s3] sm:$0xff]  ;;  %v215_v22 = vld [vmem:[%s620_s5 + $0x38] sm:$0xff]  ;;  %v214_v23 = vld [vmem:[%s620_s5 + $0x30] sm:$0xff] }
   0xc   :  { %370 = vmatprep.subr.mxu1 %v439_v1  ;;  %411 = vmatprep.mubr.msk.f32.mxu0 %vm440_vm0, %v439_v1  ;;  %v213_v24 = vld [vmem:[%s620_s5 + $0x28] sm:$0xff]  ;;  %v212_v25 = vld [vmem:[%s620_s5 + $0x20] sm:$0xff]  ;;  %v211_v26 = vld [vmem:[%s620_s5 + $0x18] sm:$0xff] }
   0xd   :  { %371 = vmatpush3.msra.mxu1 %v124_v11  ;;  %396 = vmatpush3.msra.mxu0 %v215_v22  ;;  %v313_v27 = vld [vmem:[%s617_s2] ss:$0 sm:$0xff]  ;;  %v210_v32 = vld [vmem:[%s620_s5 + $0x10] sm:$0xff]  ;;  %v209_v33 = vld [vmem:[%s620_s5 + $0x8] sm:$0xff] }
   0xe   :  { %372 = vmatprep.subr.mxu1 %v439_v1  ;;  %397 = vmatprep.subr.mxu0 %v439_v1  ;;  %v208_v34 = vld [vmem:[%s620_s5] sm:$0xff]  ;;  %s417_s5 = scalar_lea.vmem %s306_s14, 128 }
   0xf   :  { %373 = vmatpush3.msra.mxu1 %v123_v12  ;;  %398 = vmatpush3.msra.mxu0 %v214_v23  ;;  %v315_v35 = vld [vmem:[%s619_s4] ss:$0 sm:$0xff]  ;;  %p418_p0 = scmp.ne.s32.totalorder %s306_s14, %s417_s5  ;;  %p423_p2 = scmp.lt.s32.totalorder %s417_s5, %s417_s5 }
  0x10   :  { %374 = vmatprep.subr.mxu1 %v439_v1  ;;  %399 = vmatprep.subr.mxu0 %v439_v1  ;;  %v316_v40 = vld [vmem:[%s621_s6] ss:$0 sm:$0xff] }
  0x11   :  { %375 = vmatpush3.msra.mxu1 %v122_v13  ;;  %400 = vmatpush3.msra.mxu0 %v213_v24  ;;  %p424_p3 = por %p423_p2, %p422_p1 }
  0x12   :  { %376 = vmatprep.subr.mxu1 %v439_v1  ;;  %401 = vmatprep.subr.mxu0 %v439_v1 }
  0x13   :  { %377 = vmatpush3.msra.mxu1 %v121_v14  ;;  %402 = vmatpush3.msra.mxu0 %v212_v25  ;;  %p425_p4 = pnand %p424_p3, %p418_p0 }
  0x14   :  { %378 = vmatprep.subr.mxu1 %v439_v1  ;;  %403 = vmatprep.subr.mxu0 %v439_v1 }
  0x15   :  { %379 = vmatpush3.msra.mxu1 %v120_v15  ;;  %404 = vmatpush3.msra.mxu0 %v211_v26 }
  0x16   :  { %380 = vmatprep.subr.mxu1 %v439_v1  ;;  %405 = vmatprep.subr.mxu0 %v439_v1 }
  0x17   :  { %381 = vmatpush3.msra.mxu1 %v119_v16  ;;  %406 = vmatpush3.msra.mxu0 %v210_v32 }
  0x18   :  { %382 = vmatprep.subr.mxu1 %v439_v1  ;;  %407 = vmatprep.subr.mxu0 %v439_v1 }
  0x19   :  { %383 = vmatpush3.msra.mxu1 %v118_v17  ;;  %408 = vmatpush3.msra.mxu0 %v209_v33 }
  0x1a   :  { %384 = vmatprep.subr.mxu1 %v439_v1  ;;  %409 = vmatprep.subr.mxu0 %v439_v1 }
  0x1b   :  { %385 = vmatpush3.msra.mxu1 %v117_v18  ;;  %410 = vmatpush3.msra.mxu0 %v208_v34 }
  0x1c   :  { %386 = vmatprep.subr.mxu1 %v439_v1 }
  0x1d   :  { %387 = vmatpush3.msra.mxu1 %v116_v19 }
  0x1e   :  { %388 = vmatprep.subr.mxu1 %v439_v1 }
  0x1f   :  { %389 = vmatpush3.msra.mxu1 %v115_v20 }
  0x20   :  { %390 = vmatprep.subr.mxu1 %v439_v1 }
  0x21   :  { %391 = vmatpush3.msra.mxu1 %v114_v21 }
  0xc9   :  { %v109_v28 = vpop.f32.mrf.mxu0 }
  0xca   :  { %v110_v29 = vadd.f32 %v313_v27, %v109_v28 }
  0xcb   :  { %v359_v30 = vpop.f32.mrf.mxu0 }
  0xcc   :  { %v113_v31 = vmax.f32 %v110_v29, 0.0 }
  0xce   :  { %393 = vmatmul.mubr.f32.vlgmr.msra.gmra.mxu1 %v113_v31 }
 0x18e   :  { %v203_v36 = vpop.f32.mrf.mxu1 }
 0x18f   :  { %v204_v37 = vadd.f32 %v315_v35, %v203_v36 }
 0x190   :  { %v394_v38 = vpop.f32.mrf.mxu1 }
 0x191   :  { %v207_v39 = vmax.f32 %v204_v37, 0.0 }
 0x193   :  { %412 = vmatmul.mubr.msk.f32.vlgmr.msra.gmra.mxu0 %vm223_vm2, %v207_v39 }
 0x253   :  { %v293_v41 = vpop.f32.mrf.mxu0 }
 0x254   :  { %v294_v42 = vadd.f32 %v316_v40, %v293_v41 }
 0x255   :  { %v413_v43 = vpop.f32.mrf.mxu0 }
 0x256   :  { %298 = vst.msk [vmem:[#allocation2] sm:$0xff] %vm297_vm3, %v294_v42 }
 0x257   :  { %428 = shalt.err (!%p425_p4)
}
 0x258   :  { %308 = dma.vmem_to_hbm [thread:$0]  %s306_s14, 128, %s622_s7, [#allocation3]  }
 0x259   :  { %437 = dma.done.wait [#allocation3], 128  }
 0x25a   :  { %438 = vsyncadd [#allocation3], 4294967168 }
 0x25b   :  { %312 = vsyncpa [#allocation3], 1 }

</bundles_post_ra>
